<compile_context>
chip_gen: v6e
topology: v6e:2x2x1
jax: 0.10.0
libtpu: 0.0.40
codegen_flags: <defaults>
</compile_context>

<pallas_src>
import functools

import jax
import jax.numpy as jnp
from jax.experimental import pallas as pl
from jax.experimental.pallas import tpu as pltpu

_LANE = 128
_MAX_L = 1024


def _round_up(a: int, m: int) -> int:
    return ((a + m - 1) // m) * m


def _cardioid_kernel(re_ref, im_ref, ore_ref, oim_ref):
    re = re_ref[...]
    im = im_ref[...]
    mag2 = re * re + im * im
    # cos(angle(z)) = Re(z) / |z| = Re(z) * rsqrt(|z|^2).  The single select
    # only guards z == 0 (output is 0 there regardless of the scale; we just
    # avoid propagating the 0 * inf NaN).  rsqrt goes to the EUP slot (free).
    scale = jnp.where(mag2 > 0.0, 0.5 * (1.0 + re * jax.lax.rsqrt(mag2)), 1.0)
    ore_ref[...] = scale * re
    oim_ref[...] = scale * im


def _cardioid_scale_jax(re, im):
    # Plain-JAX scale for the (<128-element) tail.
    mag2 = re * re + im * im
    return jnp.where(mag2 > 0.0, 0.5 * (1.0 + re * jax.lax.rsqrt(mag2)), 1.0)


def _default_row_tile() -> int:
    """Generation-aware default row tile (lane width is 1024 f32 = 4 KiB/row)."""
    try:
        kind = jax.devices()[0].device_kind.lower()
    except Exception:  # pragma: no cover - defensive
        return 512
    if "v5e" in kind or "v5 lite" in kind or "v5lite" in kind:
        return 256     # ~1 MiB/ref already gives <7% step overhead at 0.82 TB/s
    if "v7" in kind or "tpu7" in kind:
        return 1024    # 3.2 TB/s HBM: bigger tiles hide the ~0.35us step cost
    return 512         # v6e and everything else


def _pick_lane_width(n_bulk: int) -> int:
    """Largest multiple of 128 (<= 1024) dividing n_bulk (n_bulk % 128 == 0)."""
    for cand in range(_MAX_L, 0, -_LANE):
        if n_bulk % cand == 0:
            return cand
    return _LANE  # unreachable when n_bulk is a multiple of 128


def _cardioid_pallas_2d(re2, im2, rt: int, L: int):
    rows = re2.shape[0]
    grid = (-(-rows // rt),)
    block = pl.BlockSpec((rt, L), lambda i: (i, 0))
    # 2 pipeline buffers x 4 refs x tile bytes + headroom for compiler scratch.
    vmem_limit = 2 * 4 * rt * L * 4 + (8 << 20)
    return pl.pallas_call(
        _cardioid_kernel,
        grid=grid,
        in_specs=[block, block],
        out_specs=(block, block),
        out_shape=(
            jax.ShapeDtypeStruct((rows, L), jnp.float32),
            jax.ShapeDtypeStruct((rows, L), jnp.float32),
        ),
        input_output_aliases={0: 0, 1: 1},
        compiler_params=pltpu.CompilerParams(
            dimension_semantics=("parallel",),
            vmem_limit_bytes=vmem_limit,
        ),
    )(re2, im2)


def _cardioid_flat(re, im, row_tile: int):
    """re, im: flat float32 planes of length n.  Returns flat (out_re, out_im)."""
    n = re.shape[0]
    bulk = (n // _LANE) * _LANE          # kernel-handled region (no padding copy)
    tail = n - bulk                       # < 128 elements, handled in plain JAX

    bulk_re = bulk_im = None
    if bulk:
        L = _pick_lane_width(bulk)
        rows = bulk // L
        if rows > row_tile:
            rt = row_tile                 # multiple of 8 by construction
        else:
            # Prefer >=2 grid steps so "parallel" can shard across v7x's 2 TCs.
            rt = _round_up(-(-rows // 2), 8)
            if rt > rows:
                rt = rows                 # single full-extent block (any rows)
        r2 = re[:bulk].reshape(rows, L)   # bitcast, no copy
        i2 = im[:bulk].reshape(rows, L)
        bulk_re, bulk_im = _cardioid_pallas_2d(r2, i2, rt, L)
        bulk_re = bulk_re.reshape(-1)
        bulk_im = bulk_im.reshape(-1)

    if tail:
        re_t = re[bulk:]
        im_t = im[bulk:]
        s = _cardioid_scale_jax(re_t, im_t)
        tail_re = s * re_t
        tail_im = s * im_t
        if bulk:
            return (jnp.concatenate([bulk_re, tail_re]),
                    jnp.concatenate([bulk_im, tail_im]))
        return tail_re, tail_im

    return bulk_re, bulk_im


@functools.partial(jax.jit, static_argnames=("row_tile",))
def cv_cardioid_planar(re, im, *, row_tile=None):
    """Planar API: takes/returns (re, im) float32 planes of identical shape.

    Use this between adjacent complex-valued layers to avoid the complex
    split / rebuild HBM passes entirely.
    """
    re = jnp.asarray(re, jnp.float32)
    im = jnp.asarray(im, jnp.float32)
    assert re.shape == im.shape
    shape = re.shape
    n = re.size
    if n == 0:
        return re, im
    if row_tile is None:
        row_tile = _default_row_tile()
    out_re, out_im = _cardioid_flat(re.reshape(-1), im.reshape(-1), row_tile)
    return out_re.reshape(shape), out_im.reshape(shape)


@functools.partial(jax.jit, static_argnames=("row_tile",))
def cv_cardioid(z: jax.Array, *, row_tile=None) -> jax.Array:
    """Complex cardioid activation via a Pallas TPU kernel.

    Args:
        z: complex64 array of arbitrary shape (e.g. NCHW).
    Returns:
        complex64 array, same shape: 0.5 * (1 + cos(angle(z))) * z
    """
    z = jnp.asarray(z, dtype=jnp.complex64)
    orig_shape = z.shape
    n = z.size
    if n == 0:
        return z
    if row_tile is None:
        row_tile = _default_row_tile()

    re = jnp.real(z).reshape(-1)
    im = jnp.imag(z).reshape(-1)
    out_re, out_im = _cardioid_flat(re, im, row_tile)
    return jax.lax.complex(out_re.reshape(orig_shape), out_im.reshape(orig_shape))


def _reference(z: jax.Array) -> jax.Array:
    # Pure-JAX reference matching the PyTorch semantics.
    ang = jnp.angle(z)
    return (0.5 * (1.0 + jnp.cos(ang))).astype(jnp.complex64) * z


if __name__ == "__main__":
    key = jax.random.PRNGKey(0)
    k_re, k_im, k_re2, k_im2 = jax.random.split(key, 4)

    # Main test: NCHW shape from the module's typical usage (n divisible by 1024).
    shape = (2, 4, 16, 16)
    re = jax.random.normal(k_re, shape, dtype=jnp.float32)
    im = jax.random.normal(k_im, shape, dtype=jnp.float32)
    z = jax.lax.complex(re, im)
    out = jax.block_until_ready(cv_cardioid(z))
    ref = _reference(z)
    assert out.shape == shape and out.dtype == jnp.complex64
    assert jnp.allclose(out, ref, atol=1e-5, rtol=1e-4), float(
        jnp.max(jnp.abs(out - ref))
    )

    # Ragged test: n = 315 (not a multiple of 128) exercises the bulk+tail path.
    shape2 = (3, 5, 7, 3)
    re2 = jax.random.normal(k_re2, shape2, dtype=jnp.float32)
    im2 = jax.random.normal(k_im2, shape2, dtype=jnp.float32)
    z2 = jax.lax.complex(re2, im2)
    out2 = jax.block_until_ready(cv_cardioid(z2))
    ref2 = _reference(z2)
    assert out2.shape == shape2 and out2.dtype == jnp.complex64
    assert jnp.allclose(out2, ref2, atol=1e-5, rtol=1e-4), float(
        jnp.max(jnp.abs(out2 - ref2))
    )

    print("KERNEL_OK")
</pallas_src>

<mosaic_0001>
module attributes {stable_mosaic.version = 11 : i64} {
  func.func @_cardioid_kernel(%arg0: i32, %arg1: memref<2x1024xf32, #tpu.memory_space<vmem>>, %arg2: memref<2x1024xf32, #tpu.memory_space<vmem>>, %arg3: memref<2x1024xf32, #tpu.memory_space<vmem>>, %arg4: memref<2x1024xf32, #tpu.memory_space<vmem>>) attributes {dimension_semantics = [#tpu.dimension_semantics<parallel>], iteration_bounds = array<i64: 1>, scalar_prefetch = 0 : i64, scratch_operands = 0 : i64, tpu.core_type = #tpu.core_type<tc>, window_params = [{transform_indices = @transform_0, window_bounds = array<i64: 2, 1024>}, {transform_indices = @transform_1, window_bounds = array<i64: 2, 1024>}, {transform_indices = @transform_2, window_bounds = array<i64: 2, 1024>}, {transform_indices = @transform_3, window_bounds = array<i64: 2, 1024>}]} {
    %c0 = arith.constant 0 : index
    %c0_0 = arith.constant 0 : index
    %0 = vector.load %arg1[%c0, %c0_0] : memref<2x1024xf32, #tpu.memory_space<vmem>>, vector<2x1024xf32>
    %c0_1 = arith.constant 0 : index
    %c0_2 = arith.constant 0 : index
    %1 = vector.load %arg2[%c0_1, %c0_2] : memref<2x1024xf32, #tpu.memory_space<vmem>>, vector<2x1024xf32>
    %2 = arith.mulf %0, %0 : vector<2x1024xf32>
    %3 = arith.mulf %1, %1 : vector<2x1024xf32>
    %4 = arith.addf %2, %3 : vector<2x1024xf32>
    %cst = arith.constant 0.000000e+00 : f32
    %5 = vector.broadcast %cst : f32 to vector<2x1024xf32>
    %6 = arith.cmpf ogt, %4, %5 : vector<2x1024xf32>
    %7 = math.rsqrt %4 : vector<2x1024xf32>
    %8 = arith.mulf %0, %7 : vector<2x1024xf32>
    %cst_3 = arith.constant 1.000000e+00 : f32
    %9 = vector.broadcast %cst_3 : f32 to vector<2x1024xf32>
    %10 = arith.addf %9, %8 : vector<2x1024xf32>
    %cst_4 = arith.constant 5.000000e-01 : f32
    %11 = vector.broadcast %cst_4 : f32 to vector<2x1024xf32>
    %12 = arith.mulf %11, %10 : vector<2x1024xf32>
    %cst_5 = arith.constant 1.000000e+00 : f32
    %13 = vector.broadcast %cst_5 : f32 to vector<2x1024xf32>
    %14 = arith.select %6, %12, %13 : vector<2x1024xi1>, vector<2x1024xf32>
    %15 = arith.mulf %14, %0 : vector<2x1024xf32>
    %c0_6 = arith.constant 0 : index
    %c0_7 = arith.constant 0 : index
    %16 = vector.load %arg3[%c0_6, %c0_7] : memref<2x1024xf32, #tpu.memory_space<vmem>>, vector<2x1024xf32>
    tpu.vector_store %arg3[%c0_6, %c0_7], %15 {strides = array<i32>} : memref<2x1024xf32, #tpu.memory_space<vmem>>, vector<2x1024xf32>,
    %17 = arith.mulf %14, %1 : vector<2x1024xf32>
    %c0_8 = arith.constant 0 : index
    %c0_9 = arith.constant 0 : index
    %18 = vector.load %arg4[%c0_8, %c0_9] : memref<2x1024xf32, #tpu.memory_space<vmem>>, vector<2x1024xf32>
    tpu.vector_store %arg4[%c0_8, %c0_9], %17 {strides = array<i32>} : memref<2x1024xf32, #tpu.memory_space<vmem>>, vector<2x1024xf32>,
    return
  }
  func.func @transform_0(%arg0: i32) -> (i32, i32) {
    %c0_i32 = arith.constant 0 : i32
    %c0_i32_0 = arith.constant 0 : i32
    return %arg0, %c0_i32 : i32, i32
  }
  func.func @transform_1(%arg0: i32) -> (i32, i32) {
    %c0_i32 = arith.constant 0 : i32
    %c0_i32_0 = arith.constant 0 : i32
    return %arg0, %c0_i32 : i32, i32
  }
  func.func @transform_2(%arg0: i32) -> (i32, i32) {
    %c0_i32 = arith.constant 0 : i32
    %c0_i32_0 = arith.constant 0 : i32
    return %arg0, %c0_i32 : i32, i32
  }
  func.func @transform_3(%arg0: i32) -> (i32, i32) {
    %c0_i32 = arith.constant 0 : i32
    %c0_i32_0 = arith.constant 0 : i32
    return %arg0, %c0_i32 : i32, i32
  }
}

</mosaic_0001>

<bundles_post_ra>
// kernel: custom-call
= control target key start
LH: loop header
LB: loop body
LE: loop exit
PB: predicated region body
PF: predicated region fallthrough
CT: control target
= control target key end

     0   :  { %2 = vsyncpa [#allocation0], 0  ;;  %s47_s0 = inlined_call_operand.hbm [shape: c64[2,4,16,16], index: 0, kind: input, shape index: {}]   ;;  %s48_s1 = inlined_call_operand.vmem [shape: f32[2,4,16,16], index: 1, kind: output, shape index: {}]  }
   0x1   :  { %s3_s8 = sshll.u32 %s48_s1, 4  ;;  %s4_s8 = int_to_ptr.vmem [resolvable:$true] %s3_s8 }
   0x2   :  { %s17_s9 = scalar_lea.vmem %s4_s8, 2048  ;;  %p22_p1 = scmp.lt.s32.totalorder %s4_s8, %s4_s8 }
   0x3   :  { %p18_p0 = scmp.ne.s32.totalorder %s4_s8, %s17_s9  ;;  %p23_p2 = scmp.lt.s32.totalorder %s17_s9, %s17_s9 }
   0x5   :  { %p24_p3 = por %p23_p2, %p22_p1 }
   0x7   :  { %p25_p4 = pnand %p24_p3, %p18_p0 }
   0x9   :  { %28 = shalt.err (!%p25_p4)  }
   0xa   :  { %6 = dma.hbm_to_vmem [thread:$0]  %s47_s0, 2048, %s4_s8, [#allocation0] }
   0xb   :  { %29 = dma.done.wait [#allocation0], 2048  }
   0xc   :  { %30 = vsyncadd [#allocation0], 4294965248 }
   0xd   :  { %8 = vsyncpa [#allocation0], 1 }

// kernel: custom-call.1
= control target key start
LH: loop header
LB: loop body
LE: loop exit
PB: predicated region body
PF: predicated region fallthrough
CT: control target
= control target key end

     0   :  { %s51_s0 = inlined_call_operand.hbm [shape: c64[2,4,16,16], index: 0, kind: input, shape index: {}]   ;;  %s52_s1 = inlined_call_operand.vmem [shape: f32[2,4,16,16], index: 1, kind: output, shape index: {}]  }
   0x1   :  { %s2_s8 = scalar_lea.hbm %s51_s0, 2048 }
   0x2   :  { %3 = vsyncpa [#allocation0], 0  ;;  %s4_s11 = sshll.u32 %s52_s1, 4  ;;  %s5_s11 = int_to_ptr.vmem [resolvable:$true] %s4_s11 }
   0x3   :  { %s20_s12 = scalar_lea.vmem %s5_s11, 2048  ;;  %p25_p1 = scmp.lt.s32.totalorder %s5_s11, %s5_s11 }
   0x4   :  { %p21_p0 = scmp.ne.s32.totalorder %s5_s11, %s20_s12  ;;  %p26_p2 = scmp.lt.s32.totalorder %s20_s12, %s20_s12 }
   0x6   :  { %p27_p3 = por %p26_p2, %p25_p1 }
   0x8   :  { %p28_p4 = pnand %p27_p3, %p21_p0 }
   0xa   :  { %31 = shalt.err (!%p28_p4)  }
   0xb   :  { %7 = dma.hbm_to_vmem [thread:$0]  %s2_s8, 2048, %s5_s11, [#allocation0] }
   0xc   :  { %33 = dma.done.wait [#allocation0], 2048  }
   0xd   :  { %34 = vsyncadd [#allocation0], 4294965248 }
   0xe   :  { %9 = vsyncpa [#allocation0], 1 }

// kernel: custom-call.2
= control target key start
LH: loop header
LB: loop body
LE: loop exit
PB: predicated region body
PF: predicated region fallthrough
CT: control target
= control target key end

     0   :  { %s92_s0 = inlined_call_operand.vmem [shape: f32[2,4,16,16], index: 0, kind: input, shape index: {}]   ;;  %s93_s1 = inlined_call_operand.vmem [shape: f32[2,4,16,16], index: 1, kind: input, shape index: {}]   ;;  %s94_s2 = inlined_call_operand.hbm [shape: c64[2,4,16,16], index: 2, kind: output, shape index: {}]  }
   0x1   :  { %s3_s11 = scalar_lea.hbm %s94_s2, 2048 }
   0x2   :  { %4 = vsyncpa [#allocation0], 0  ;;  %s5_s14 = sshll.u32 %s92_s0, 4  ;;  %s6_s14 = int_to_ptr.vmem [resolvable:$true] %s5_s14 }
   0x3   :  { %s18_s15 = scalar_lea.vmem %s6_s14, 2048  ;;  %p23_p1 = scmp.lt.s32.totalorder %s6_s14, %s6_s14 }
   0x4   :  { %p19_p0 = scmp.ne.s32.totalorder %s6_s14, %s18_s15  ;;  %p24_p2 = scmp.lt.s32.totalorder %s18_s15, %s18_s15 }
   0x6   :  { %p25_p3 = por %p24_p2, %p23_p1 }
   0x8   :  { %p26_p4 = pnand %p25_p3, %p19_p0 }
   0xa   :  { %29 = shalt.err (!%p26_p4)  }
   0xb   :  { %8 = dma.vmem_to_hbm [thread:$0]  %s6_s14, 2048, %s94_s2, [#allocation0] }
   0xc   :  { %61 = dma.done.wait [#allocation0], 2048  }
   0xd   :  { %62 = vsyncadd [#allocation0], 4294965248 }
   0xe   :  { %10 = vsyncpa [#allocation0], 1 }
   0xf   :  { %11 = vsyncpa [#allocation1], 0  ;;  %s12_s0 = sshll.u32 %s93_s1, 4  ;;  %s13_s0 = int_to_ptr.vmem [resolvable:$true] %s12_s0 }
  0x10   :  { %s38_s20 = scalar_lea.vmem %s13_s0, 2048  ;;  %p43_p6 = scmp.lt.s32.totalorder %s13_s0, %s13_s0 }
  0x11   :  { %p39_p5 = scmp.ne.s32.totalorder %s13_s0, %s38_s20  ;;  %p44_p7 = scmp.lt.s32.totalorder %s38_s20, %s38_s20 }
  0x13   :  { %p45_p8 = por %p44_p7, %p43_p6 }
  0x15   :  { %p46_p9 = pnand %p45_p8, %p39_p5 }
  0x17   :  { %49 = shalt.err (!%p46_p9)  }
  0x18   :  { %15 = dma.vmem_to_hbm [thread:$0]  %s13_s0, 2048, %s3_s11, [#allocation1] }
  0x19   :  { %63 = dma.done.wait [#allocation1], 2048  }
  0x1a   :  { %64 = vsyncadd [#allocation1], 4294965248 }
  0x1b   :  { %17 = vsyncpa [#allocation1], 1 }

// kernel: cv_cardioid.1
= control target key start
LH: loop header
LB: loop body
LE: loop exit
PB: predicated region body
PF: predicated region fallthrough
CT: control target
= control target key end

     0   :  { %s99_s0 = inlined_call_operand.vmem [shape: f32[2,1024], index: 0, kind: input, shape index: {}, may-alias: {0,2}]   ;;  %s100_s1 = inlined_call_operand.vmem [shape: f32[2,1024], index: 1, kind: input, shape index: {}, may-alias: {1,3}]   ;;  %s101_s2 = inlined_call_operand.vmem [shape: f32[2,1024], index: 2, kind: output, shape index: {0}, may-alias: {0,2}]   ;;  %s102_s3 = inlined_call_operand.vmem [shape: f32[2,1024], index: 3, kind: output, shape index: {1}, may-alias: {1,3}]  }
   0x1   :  { %v13_v0 = vld [vmem:[%s99_s0] sm:$0xff]  ;;  %v14_v2 = vld [vmem:[%s99_s0 + $0x8] sm:$0xff] }
   0x2   :  { %v15_v1 = vld [vmem:[%s100_s1] sm:$0xff]  ;;  %v17_v3 = vmul.f32 %v13_v0, %v13_v0  ;;  %v16_v5 = vld [vmem:[%s100_s1 + $0x8] sm:$0xff]  ;;  %v18_v6 = vmul.f32 %v14_v2, %v14_v2 }
   0x3   :  { %v19_v4 = vmul.f32 %v15_v1, %v15_v1  ;;  %v20_v7 = vmul.f32 %v16_v5, %v16_v5 }
   0x5   :  { %v21_v8 = vadd.f32 %v19_v4, %v17_v3  ;;  %v22_v9 = vadd.f32 %v20_v7, %v18_v6 }
   0x7   :  { %51 = vrsqrt.f32 %v21_v8  ;;  %vm23_vm0 = vcmp.gt.f32.partialorder %v21_v8, 0.0  ;;  %vm24_vm1 = vcmp.gt.f32.partialorder %v22_v9, 0.0 }
   0x8   :  { %53 = vrsqrt.f32 %v22_v9 }
  0x14   :  { %v52_v10 = vpop.eup %51 }
  0x15   :  { %v54_v11 = vpop.eup %53  ;;  %v27_v12 = vmul.f32 %v52_v10, %v13_v0 }
  0x16   :  { %v28_v13 = vmul.f32 %v54_v11, %v14_v2 }
  0x17   :  { %v29_v14 = vadd.f32 1.0, %v27_v12 }
  0x18   :  { %v30_v15 = vadd.f32 1.0, %v28_v13 }
  0x19   :  { %v31_v16 = vmul.f32 0.5, %v29_v14 }
  0x1a   :  { %v32_v17 = vmul.f32 0.5, %v30_v15 }
  0x1b   :  { %v33_v18 = vsel %vm23_vm0, %v31_v16, 1.0 }
  0x1c   :  { %v35_v19 = vmul.f32 %v33_v18, %v13_v0  ;;  %v34_v20 = vsel %vm24_vm1, %v32_v17, 1.0  ;;  %v39_v21 = vmul.f32 %v33_v18, %v15_v1 }
  0x1d   :  { %v36_v22 = vmul.f32 %v34_v20, %v14_v2  ;;  %v40_v23 = vmul.f32 %v34_v20, %v16_v5 }
  0x1e   :  { %37 = vst [vmem:[%s101_s2] sm:$0xff] %v35_v19  ;;  %41 = vst [vmem:[%s102_s3] sm:$0xff] %v39_v21 }
  0x1f   :  { %38 = vst [vmem:[%s101_s2 + $0x8] sm:$0xff] %v36_v22  ;;  %42 = vst [vmem:[%s102_s3 + $0x8] sm:$0xff] %v40_v23 }

</bundles_post_ra>
